<compile_context>
chip_gen: v7x
topology: tpu7x:2x2x1
jax: 0.10.0
libtpu: 0.0.40
codegen_flags: <defaults>
</compile_context>

<pallas_src>
import jax
import jax.numpy as jnp
from jax.experimental import pallas as pl
from jax.experimental.pallas import tpu as pltpu


def _fused_heads_kernel(x_ref, w_ref, b_ref, o_ref, acc_ref):
    # x_ref: (tm, tk), w_ref: (tk, tn), b_ref: (1, tn),
    # o_ref: (tm, tn), acc_ref: (tm, tn) f32 scratch (output-resident over K).
    k = pl.program_id(2)

    @pl.when(k == 0)
    def _():
        acc_ref[...] = jnp.zeros_like(acc_ref)

    acc_ref[...] += jnp.dot(x_ref[...], w_ref[...],
                            preferred_element_type=jnp.float32)

    @pl.when(k == pl.num_programs(2) - 1)
    def _():
        o_ref[...] = (acc_ref[...] + b_ref[...]).astype(o_ref.dtype)


def _pick_tile(dim, preferred):
    # Tile only when the dim divides evenly by the preferred tile; otherwise
    # use the full extent (always a legal block shape, stays correct).
    if dim > preferred and dim % preferred == 0:
        return preferred
    return dim


def mu_logvar(x, weights, biases, *, out_dtype=jnp.float32,
              compute_dtype=None, tm=256, tn=256, tk=512):
    """Apply N fused linear bottleneck heads to x.

    x:       (..., H)        (any leading batch dims, like nn.Linear)
    weights: (N, H, L)       (already transposed from PyTorch's (L, H) per head)
    biases:  (N, 1, L)
    returns: list of N arrays, each (..., L)   -- matches Mu_Logvar.forward
    """
    num_layers, H, L = weights.shape
    lead = x.shape[:-1]
    x2 = x.reshape(-1, H)
    B = x2.shape[0]
    NL = num_layers * L

    # Fuse heads: columns [i*L:(i+1)*L] of the fused weight/bias are head i.
    w_fused = jnp.transpose(weights, (1, 0, 2)).reshape(H, NL)
    b_fused = biases.reshape(1, NL).astype(jnp.float32)

    # Optional bf16 storage/compute (v6e/v7x): MXU runs at bf16 rate and
    # weight DMA traffic halves; accumulation stays f32 inside the kernel.
    if compute_dtype is not None:
        x2 = x2.astype(compute_dtype)
        w_fused = w_fused.astype(compute_dtype)

    tm = _pick_tile(B, tm)
    tn = _pick_tile(NL, tn)
    tk = _pick_tile(H, tk)
    grid = (B // tm, NL // tn, H // tk)

    out = pl.pallas_call(
        _fused_heads_kernel,
        out_shape=jax.ShapeDtypeStruct((B, NL), out_dtype),
        grid=grid,
        in_specs=[
            pl.BlockSpec((tm, tk), lambda i, j, k: (i, k)),   # x tile
            pl.BlockSpec((tk, tn), lambda i, j, k: (k, j)),   # fused W tile
            pl.BlockSpec((1, tn), lambda i, j, k: (0, j)),    # fused bias
        ],
        out_specs=pl.BlockSpec((tm, tn), lambda i, j, k: (i, j)),
        scratch_shapes=[pltpu.VMEM((tm, tn), jnp.float32)],
        compiler_params=pltpu.CompilerParams(
            dimension_semantics=("parallel", "parallel", "arbitrary")),
    )(x2, w_fused, b_fused)

    # Contiguous last-axis split back into the per-head list.
    return [out[:, i * L:(i + 1) * L].reshape(*lead, L)
            for i in range(num_layers)]


if __name__ == "__main__":
    # Small shapes implied by the forward: batch=2, hidden=32, latent=16,
    # two bottleneck heads (mu, logvar).
    B, H, L, N = 2, 32, 16, 2

    key = jax.random.PRNGKey(0)
    kx, kw, kb = jax.random.split(key, 3)

    x = jax.random.normal(kx, (B, H), dtype=jnp.float32)
    weights = jax.random.normal(kw, (N, H, L), dtype=jnp.float32) * 0.1
    biases = jax.random.normal(kb, (N, 1, L), dtype=jnp.float32) * 0.1

    outs = mu_logvar(x, weights, biases)
    outs = [jax.block_until_ready(o) for o in outs]

    # Pure-JAX reference check (mu, logvar heads).
    refs = [x @ weights[i] + biases[i] for i in range(N)]
    for o, r in zip(outs, refs):
        assert o.shape == (B, L)
        assert jnp.allclose(o, r, atol=1e-5, rtol=1e-5)

    print("KERNEL_OK")
</pallas_src>

<mosaic_0001>
module attributes {stable_mosaic.version = 11 : i64} {
  func.func @_fused_heads_kernel(%arg0: i32, %arg1: i32, %arg2: i32, %arg3: memref<2x32xf32, #tpu.memory_space<vmem>>, %arg4: memref<32x32xf32, #tpu.memory_space<vmem>>, %arg5: memref<1x32xf32, #tpu.memory_space<vmem>>, %arg6: memref<2x32xf32, #tpu.memory_space<vmem>>, %arg7: memref<2x32xf32, #tpu.memory_space<vmem>>) attributes {dimension_semantics = [#tpu.dimension_semantics<parallel>, #tpu.dimension_semantics<parallel>, #tpu.dimension_semantics<arbitrary>], iteration_bounds = array<i64: 1, 1, 1>, scalar_prefetch = 0 : i64, scratch_operands = 1 : i64, tpu.core_type = #tpu.core_type<tc>, window_params = [{transform_indices = @transform_0, window_bounds = array<i64: 2, 32>}, {transform_indices = @transform_1, window_bounds = array<i64: 32, 32>}, {transform_indices = @transform_2, window_bounds = array<i64: 1, 32>}, {transform_indices = @transform_3, window_bounds = array<i64: 2, 32>}]} {
    %c0_i32 = arith.constant 0 : i32
    %0 = arith.cmpi eq, %arg2, %c0_i32 : i32
    %1 = arith.extui %0 : i1 to i32
    %c0_i32_0 = arith.constant 0 : i32
    %2 = arith.cmpi ne, %1, %c0_i32_0 : i32
    scf.if %2 {
      %cst_10 = arith.constant 0.000000e+00 : f32
      %12 = vector.broadcast %cst_10 : f32 to vector<2x32xf32>
      %c0_11 = arith.constant 0 : index
      %c0_12 = arith.constant 0 : index
      %13 = vector.load %arg7[%c0_11, %c0_12] : memref<2x32xf32, #tpu.memory_space<vmem>>, vector<2x32xf32>
      tpu.vector_store %arg7[%c0_11, %c0_12], %12 {strides = array<i32>} : memref<2x32xf32, #tpu.memory_space<vmem>>, vector<2x32xf32>,
    } else {
    }
    %c0 = arith.constant 0 : index
    %c0_1 = arith.constant 0 : index
    %3 = vector.load %arg7[%c0, %c0_1] : memref<2x32xf32, #tpu.memory_space<vmem>>, vector<2x32xf32>
    %c0_2 = arith.constant 0 : index
    %c0_3 = arith.constant 0 : index
    %4 = vector.load %arg3[%c0_2, %c0_3] : memref<2x32xf32, #tpu.memory_space<vmem>>, vector<2x32xf32>
    %c0_4 = arith.constant 0 : index
    %c0_5 = arith.constant 0 : index
    %5 = vector.load %arg4[%c0_4, %c0_5] : memref<32x32xf32, #tpu.memory_space<vmem>>, vector<32x32xf32>
    %cst = arith.constant dense<0.000000e+00> : vector<2x32xf32>
    %6 = tpu.matmul %4, %5, %cst {dimension_numbers = #tpu.dot_dimension_numbers<[1], [0], [0], [1], [0, 0, 1, 1], [], []>} : vector<2x32xf32>, vector<32x32xf32>, vector<2x32xf32> -> vector<2x32xf32>
    %7 = arith.addf %3, %6 : vector<2x32xf32>
    %c0_6 = arith.constant 0 : index
    %c0_7 = arith.constant 0 : index
    %8 = vector.load %arg7[%c0_6, %c0_7] : memref<2x32xf32, #tpu.memory_space<vmem>>, vector<2x32xf32>
    tpu.vector_store %arg7[%c0_6, %c0_7], %7 {strides = array<i32>} : memref<2x32xf32, #tpu.memory_space<vmem>>, vector<2x32xf32>,
    %c0_i32_8 = arith.constant 0 : i32
    %9 = arith.cmpi eq, %arg2, %c0_i32_8 : i32
    %10 = arith.extui %9 : i1 to i32
    %c0_i32_9 = arith.constant 0 : i32
    %11 = arith.cmpi ne, %10, %c0_i32_9 : i32
    scf.if %11 {
      %c0_10 = arith.constant 0 : index
      %c0_11 = arith.constant 0 : index
      %12 = vector.load %arg7[%c0_10, %c0_11] : memref<2x32xf32, #tpu.memory_space<vmem>>, vector<2x32xf32>
      %c0_12 = arith.constant 0 : index
      %c0_13 = arith.constant 0 : index
      %13 = vector.load %arg5[%c0_12, %c0_13] : memref<1x32xf32, #tpu.memory_space<vmem>>, vector<1x32xf32>
      %14 = vector.broadcast %13 : vector<1x32xf32> to vector<2x32xf32>
      %15 = arith.addf %12, %14 : vector<2x32xf32>
      %c0_14 = arith.constant 0 : index
      %c0_15 = arith.constant 0 : index
      %16 = vector.load %arg6[%c0_14, %c0_15] : memref<2x32xf32, #tpu.memory_space<vmem>>, vector<2x32xf32>
      tpu.vector_store %arg6[%c0_14, %c0_15], %15 {strides = array<i32>} : memref<2x32xf32, #tpu.memory_space<vmem>>, vector<2x32xf32>,
    } else {
    }
    return
  }
  func.func @transform_0(%arg0: i32, %arg1: i32, %arg2: i32) -> (i32, i32) {
    %c0_i32 = arith.constant 0 : i32
    return %arg0, %arg2 : i32, i32
  }
  func.func @transform_1(%arg0: i32, %arg1: i32, %arg2: i32) -> (i32, i32) {
    %c0_i32 = arith.constant 0 : i32
    return %arg2, %arg1 : i32, i32
  }
  func.func @transform_2(%arg0: i32, %arg1: i32, %arg2: i32) -> (i32, i32) {
    %c0_i32 = arith.constant 0 : i32
    %c0_i32_0 = arith.constant 0 : i32
    return %c0_i32, %arg1 : i32, i32
  }
  func.func @transform_3(%arg0: i32, %arg1: i32, %arg2: i32) -> (i32, i32) {
    %c0_i32 = arith.constant 0 : i32
    return %arg0, %arg1 : i32, i32
  }
}

</mosaic_0001>

<bundles_post_ra>
// kernel: tpu_custom_call.1
= control target key start
LH: loop header
LB: loop body
LE: loop exit
PB: predicated region body
PF: predicated region fallthrough
CT: control target
= control target key end

     0   :  { %8 = vsyncpa [#allocation4], 0  ;;  %s340_s0 = inlined_call_operand.hbm [shape: f32[2,32], index: 0, kind: input, shape index: {}]   ;;  %s341_s1 = inlined_call_operand.hbm [shape: f32[32,32], index: 1, kind: input, shape index: {}]   ;;  %s342_s2 = inlined_call_operand.vmem [shape: f32[1,32], index: 2, kind: input, shape index: {}]   ;;  %s343_s3 = inlined_call_operand.hbm [shape: f32[2,32], index: 3, kind: output, shape index: {}]  }
   0x1   :  { %9 = vsyncpa [#allocation7], 0 }
   0x2   :  { %10 = vsyncpa [#allocation5], 0  ;;  %s263_s12 = smov [#allocation3]   ;;  %s264_s14 = smov [#allocation6]  }
   0x3   :  { %s17_s13 = sshll.u32 %s263_s12, 4  ;;  %s26_s15 = sshll.u32 %s264_s14, 4  ;;  %s18_s13 = int_to_ptr.vmem [resolvable:$true] %s17_s13  ;;  %s291_s15 = int_to_ptr.vmem [resolvable:$true] %s26_s15 }
   0x4   :  { %s191_s18 = scalar_lea.hbm %s340_s0, 32 }
   0x5   :  { %p192_p0 = scmp.ne.s32.totalorder %s340_s0, %s191_s18  ;;  %p195_p1 = scmp.lt.u32.totalorder %s191_s18, %s340_s0 }
   0x7   :  { %p197_p2 = pnand %p195_p1, %p192_p0 }
   0x9   :  { %200 = shalt.err (!%p197_p2)
}
   0xa   :  { %s201_s23 = scalar_lea.vmem %s18_s13, 32  ;;  %p206_p4 = scmp.lt.s32.totalorder %s18_s13, %s18_s13 }
   0xb   :  { %p202_p3 = scmp.ne.s32.totalorder %s18_s13, %s201_s23  ;;  %p207_p5 = scmp.lt.s32.totalorder %s201_s23, %s201_s23 }
   0xd   :  { %p208_p6 = por %p207_p5, %p206_p4 }
   0xf   :  { %p209_p7 = pnand %p208_p6, %p202_p3 }
  0x11   :  { %212 = shalt.err (!%p209_p7)
}
  0x12   :  { %20 = dma.hbm_to_vmem [thread:$0]  %s340_s0, 32, %s18_s13, [#allocation4]  }
  0x13   :  { %s213_s28 = scalar_lea.hbm %s341_s1, 512 }
  0x14   :  { %p214_p8 = scmp.ne.s32.totalorder %s341_s1, %s213_s28  ;;  %p217_p9 = scmp.lt.u32.totalorder %s213_s28, %s341_s1 }
  0x16   :  { %p219_p10 = pnand %p217_p9, %p214_p8 }
  0x18   :  { %222 = shalt.err (!%p219_p10)
}
  0x19   :  { %s223_s6 = scalar_lea.vmem %s291_s15, 512  ;;  %p228_p12 = scmp.lt.s32.totalorder %s291_s15, %s291_s15 }
  0x1a   :  { %p224_p11 = scmp.ne.s32.totalorder %s291_s15, %s223_s6  ;;  %p229_p13 = scmp.lt.s32.totalorder %s223_s6, %s223_s6 }
  0x1c   :  { %p230_p0 = por %p229_p13, %p228_p12 }
  0x1e   :  { %p231_p1 = pnand %p230_p0, %p224_p11 }
  0x20   :  { %234 = shalt.err (!%p231_p1)
}
  0x21   :  { %s265_s0 = smov 128   ;;  %s266_s7 = smov 8  }
  0x22   :  { %32 = dma.hbm_to_vmem [thread:$0]  %s341_s1, 512, %s291_s15, [#allocation7], %s265_s0, %s265_s0, %s266_s7  }
  0x23   :  { %257 = dma.done.wait [#allocation4], 32  }
  0x24   :  { %258 = vsyncadd [#allocation4], 4294967264 }
  0x25   :  { %259 = dma.done.wait [#allocation7], 512  }
  0x26   :  { %260 = vsyncadd [#allocation7], 4294966784  ;;  %vm45_vm0 = vcmask 254976   ;;  %v267_v0 = vmov 0.0|0.0   ;;  %v268_v1 = vmov 0.0   ;;  %vm269_vm1 = vmmov 0  }
  0x27   :  { %177 = vmatprep.subr.bf16.mxu0 %v267_v0  ;;  %46 = vst.msk [vmem:[#allocation2] sm:$0x3] %vm45_vm0, %v268_v1  ;;  %174 = vmatprep.mubr.msk.f32.mxu0 %vm269_vm1, %v268_v1  ;;  %v49_v2 = vld [vmem:[#allocation6] sm:$0xff]  ;;  %v50_v3 = vld [vmem:[#allocation6 + $0x8] sm:$0xff]  ;;  %v51_v4 = vld [vmem:[#allocation6 + $0x10] sm:$0xff]  ;;  %vm53_vm2 = vcmask 261120  }
  0x28   :  { %v178_v5 = vpack.c.bf16 %v50_v3, %v49_v2  ;;  %v52_v6 = vld [vmem:[#allocation6 + $0x18] sm:$0xff]  ;;  %s270_s11 = smov [#allocation8]  }
  0x29   :  { %v181_v7 = vpack.c.bf16 %v52_v6, %v51_v4  ;;  %v48_v8 = vld [vmem:[#allocation3] sm:$0x3]  ;;  %v160_v13 = vld [vmem:[%s342_s2] ss:$0 sm:$0xff]  ;;  %s149_s12 = sshll.u32 %s270_s11, 4  ;;  %s150_s12 = int_to_ptr.vmem [resolvable:$true] %s149_s12 }
  0x2a   :  { %179 = vmatpush3.bf16.msra.mxu0 %v178_v5  ;;  %s235_s13 = scalar_lea.vmem %s150_s12, 32  ;;  %p240_p3 = scmp.lt.s32.totalorder %s150_s12, %s150_s12 }
  0x2b   :  { %180 = vmatprep.subr.bf16.mxu0 %v267_v0  ;;  %p236_p2 = scmp.ne.s32.totalorder %s150_s12, %s235_s13  ;;  %p241_p4 = scmp.lt.s32.totalorder %s235_s13, %s235_s13 }
  0x2d   :  { %p242_p5 = por %p241_p4, %p240_p3 }
  0x2e   :  { %182 = vmatpush3.bf16.msra.mxu0 %v181_v7  ;;  %v47_v9 = vld [vmem:[#allocation2] sm:$0x3] }
  0x2f   :  { %p243_p6 = pnand %p242_p5, %p236_p2 }
  0x31   :  { %175 = vmatmul.mubr.msk.f32.vlgmr.msra.gmra.mrb[0].mxu0 %vm53_vm2, %v48_v8 }
 0x104   :  { %v123_v10 = vpop.f32.mrb[0].mxu0 }
 0x105   :  { %v127_v11 = vadd.f32 %v123_v10, %v47_v9  ;;  %v176_v12 = vpop.f32.mrb[1].mxu0 }
 0x107   :  { %129 = vst.msk [vmem:[#allocation2] sm:$0x3] %vm45_vm0, %v127_v11 }
 0x10e   :  { %v133_v14 = vld [vmem:[#allocation2] sm:$0x3] }
 0x10f   :  { %v141_v15 = vadd.f32 %v160_v13, %v133_v14 }
 0x111   :  { %142 = vst.msk [vmem:[#allocation8] sm:$0x3] %vm45_vm0, %v141_v15 }
 0x112   :  { %246 = shalt.err (!%p243_p6)
}
 0x113   :  { %s247_s16 = scalar_lea.hbm %s343_s3, 32 }
 0x114   :  { %p248_p7 = scmp.ne.s32.totalorder %s343_s3, %s247_s16  ;;  %p251_p8 = scmp.lt.u32.totalorder %s247_s16, %s343_s3 }
 0x116   :  { %p253_p9 = pnand %p251_p8, %p248_p7 }
 0x118   :  { %256 = shalt.err (!%p253_p9)
}
 0x119   :  { %152 = dma.vmem_to_hbm [thread:$0]  %s150_s12, 32, %s343_s3, [#allocation5]  }
 0x11a   :  { %261 = dma.done.wait [#allocation5], 32  }
 0x11b   :  { %262 = vsyncadd [#allocation5], 4294967264 }
 0x11c   :  { %156 = vsyncpa [#allocation4], 1 }
 0x11d   :  { %157 = vsyncpa [#allocation7], 1 }
 0x11e   :  { %158 = vsyncpa [#allocation5], 1 }

</bundles_post_ra>
